<compile_context>
chip_gen: v5e
topology: v5e:2x2
jax: 0.10.0
libtpu: 0.0.40
codegen_flags: <defaults>
</compile_context>

<pallas_src>
import functools

import jax
import jax.numpy as jnp
from jax.experimental import pallas as pl
from jax.experimental.pallas import tpu as pltpu


def _round_up(v, m):
    return (v + m - 1) // m * m


# ---------------- Kernel 1: global spatial sum (pooling numerator) ----------

def _pool_kernel(x_ref, sum_ref):
    # x_ref: (1, C, TS) tile; sum_ref: (1, C, 1) f32 accumulator, resident
    # across the (last, "arbitrary") spatial grid axis.
    s = pl.program_id(1)

    @pl.when(s == 0)
    def _():
        sum_ref[...] = jnp.zeros_like(sum_ref)

    sum_ref[...] += jnp.sum(x_ref[...].astype(jnp.float32), axis=-1, keepdims=True)


# ---------------- Kernel 2: channel MLP (two 1x1x1 convs) + sigmoid ---------

def _mlp_kernel(sum_ref, w1t_ref, b1_ref, w2t_ref, b2_ref, scale_ref, *, inv_n):
    mean = sum_ref[...] * inv_n                                             # (Bp, Cp)
    h = jnp.dot(mean, w1t_ref[...], preferred_element_type=jnp.float32) + b1_ref[...]
    h = jnp.maximum(h, 0.0)                                                 # ReLU
    z = jnp.dot(h, w2t_ref[...], preferred_element_type=jnp.float32) + b2_ref[...]
    scale_ref[...] = 1.0 / (1.0 + jnp.exp(-z))                              # sigmoid


# ---------------- Kernel 3: broadcast channel scale over spatial ------------

def _scale_kernel(scale_ref, x_ref, o_ref):
    # scale_ref: (1, C, 1) f32; x_ref/o_ref: (1, C, TS)
    o_ref[...] = (x_ref[...].astype(jnp.float32) * scale_ref[...]).astype(o_ref.dtype)


def channel_attention(x, w1, b1, w2, b2, *, target_block_bytes=2 * 1024 * 1024):
    """PyTorch ChannelAttention.forward for 5-D input x = (B, C, D, H, W).

    w1, w2: (C, C) weights of the two 1x1x1 Conv3d layers (out, in); b1, b2: (C,).
    """
    B, C, D, H, W = x.shape
    S = D * H * W
    x3 = x.reshape(B, C, S)  # free metadata reshape for contiguous NCDHW

    # Lane-dense spatial tiling: last dim a multiple of 128, ~2 MiB blocks
    # (safe for v7x 64 MiB VMEM / v5e 16 MiB scoped default with 2x buffering).
    itemsize = jnp.dtype(x.dtype).itemsize
    ts_cap = max(128, (target_block_bytes // (C * itemsize)) // 128 * 128)
    ts = min(_round_up(S, 128), ts_cap)
    s_pad = _round_up(S, ts)
    if s_pad != S:
        x3 = jnp.pad(x3, ((0, 0), (0, 0), (0, s_pad - S)))  # zeros are sum-safe
    ns = s_pad // ts

    # ---- pass 1: per-(batch, channel) spatial sums ----
    sums = pl.pallas_call(
        _pool_kernel,
        out_shape=jax.ShapeDtypeStruct((B, C, 1), jnp.float32),
        grid_spec=pltpu.PrefetchScalarGridSpec(
            num_scalar_prefetch=0,
            grid=(B, ns),
            in_specs=[pl.BlockSpec((1, C, ts), lambda b, s: (b, 0, s))],
            out_specs=pl.BlockSpec((1, C, 1), lambda b, s: (b, 0, 0)),
        ),
        compiler_params=pltpu.CompilerParams(
            dimension_semantics=("parallel", "arbitrary")),
    )(x3)

    # ---- pass 2: channel MLP + sigmoid on the (B, C) means ----
    # Pad to (8, 128)-aligned shapes so the in-kernel matmuls are tile-aligned.
    Bp, Cp = _round_up(B, 8), _round_up(C, 128)
    sums_p = jnp.zeros((Bp, Cp), jnp.float32).at[:B, :C].set(sums[:, :, 0])
    w1t_p = jnp.zeros((Cp, Cp), jnp.float32).at[:C, :C].set(w1.astype(jnp.float32).T)
    w2t_p = jnp.zeros((Cp, Cp), jnp.float32).at[:C, :C].set(w2.astype(jnp.float32).T)
    b1_p = jnp.zeros((1, Cp), jnp.float32).at[0, :C].set(b1.astype(jnp.float32))
    b2_p = jnp.zeros((1, Cp), jnp.float32).at[0, :C].set(b2.astype(jnp.float32))

    scale_p = pl.pallas_call(
        functools.partial(_mlp_kernel, inv_n=1.0 / float(S)),
        out_shape=jax.ShapeDtypeStruct((Bp, Cp), jnp.float32),
    )(sums_p, w1t_p, b1_p, w2t_p, b2_p)

    scale = scale_p[:B, :C].reshape(B, C, 1)

    # ---- pass 3: broadcast the per-channel scale over the spatial axis ----
    out3 = pl.pallas_call(
        _scale_kernel,
        out_shape=jax.ShapeDtypeStruct((B, C, s_pad), x.dtype),
        grid_spec=pltpu.PrefetchScalarGridSpec(
            num_scalar_prefetch=0,
            grid=(B, ns),
            in_specs=[
                pl.BlockSpec((1, C, 1), lambda b, s: (b, 0, 0)),
                pl.BlockSpec((1, C, ts), lambda b, s: (b, 0, s)),
            ],
            out_specs=pl.BlockSpec((1, C, ts), lambda b, s: (b, 0, s)),
        ),
        compiler_params=pltpu.CompilerParams(
            dimension_semantics=("parallel", "parallel")),
    )(scale, x3)

    if s_pad != S:
        out3 = out3[:, :, :S]
    return out3.reshape(B, C, D, H, W)


if __name__ == "__main__":
    key = jax.random.PRNGKey(0)
    kx, k1, k2, k3, k4 = jax.random.split(key, 5)

    # Small 5-D shapes consistent with Conv3d-based ChannelAttention.
    B, C, D, H, W = 2, 4, 8, 8, 8
    x = jax.random.normal(kx, (B, C, D, H, W), dtype=jnp.float32)
    w1 = jax.random.normal(k1, (C, C), dtype=jnp.float32) * 0.5
    b1 = jax.random.normal(k2, (C,), dtype=jnp.float32) * 0.1
    w2 = jax.random.normal(k3, (C, C), dtype=jnp.float32) * 0.5
    b2 = jax.random.normal(k4, (C,), dtype=jnp.float32) * 0.1

    out = channel_attention(x, w1, b1, w2, b2)
    out = jax.block_until_ready(out)

    # Pure-JAX reference of the PyTorch forward.
    mean = jnp.mean(x, axis=(2, 3, 4))                       # (B, C)
    h = jnp.maximum(mean @ w1.T + b1, 0.0)
    scale_ref = jax.nn.sigmoid(h @ w2.T + b2).reshape(B, C, 1, 1, 1)
    ref = (scale_ref * x).astype(x.dtype)

    assert out.shape == ref.shape and out.dtype == ref.dtype
    assert jnp.allclose(out, ref, atol=1e-5, rtol=1e-5), float(
        jnp.max(jnp.abs(out - ref)))
    print("KERNEL_OK")
</pallas_src>

<mosaic_0001>
module attributes {stable_mosaic.version = 11 : i64} {
  func.func @_pool_kernel(%arg0: i32, %arg1: i32, %arg2: memref<1x4x512xf32, #tpu.memory_space<vmem>>, %arg3: memref<1x4x1xf32, #tpu.memory_space<vmem>>) attributes {dimension_semantics = [#tpu.dimension_semantics<parallel>, #tpu.dimension_semantics<arbitrary>], iteration_bounds = array<i64: 2, 1>, scalar_prefetch = 0 : i64, scratch_operands = 0 : i64, tpu.core_type = #tpu.core_type<tc>, window_params = [{transform_indices = @transform_0, window_bounds = array<i64: 1, 4, 512>}, {transform_indices = @transform_1, window_bounds = array<i64: 1, 4, 1>}]} {
    %c0_i32 = arith.constant 0 : i32
    %0 = arith.cmpi eq, %arg1, %c0_i32 : i32
    %1 = arith.extui %0 : i1 to i32
    %c0_i32_0 = arith.constant 0 : i32
    %2 = arith.cmpi ne, %1, %c0_i32_0 : i32
    scf.if %2 {
      %cst_9 = arith.constant 0.000000e+00 : f32
      %9 = vector.broadcast %cst_9 : f32 to vector<1x4x1xf32>
      %c0_10 = arith.constant 0 : index
      %c0_11 = arith.constant 0 : index
      %c0_12 = arith.constant 0 : index
      %10 = vector.load %arg3[%c0_10, %c0_11, %c0_12] : memref<1x4x1xf32, #tpu.memory_space<vmem>>, vector<1x4x1xf32>
      tpu.vector_store %arg3[%c0_10, %c0_11, %c0_12], %9 {strides = array<i32>} : memref<1x4x1xf32, #tpu.memory_space<vmem>>, vector<1x4x1xf32>,
    } else {
    }
    %c0 = arith.constant 0 : index
    %c0_1 = arith.constant 0 : index
    %c0_2 = arith.constant 0 : index
    %3 = vector.load %arg3[%c0, %c0_1, %c0_2] : memref<1x4x1xf32, #tpu.memory_space<vmem>>, vector<1x4x1xf32>
    %c0_3 = arith.constant 0 : index
    %c0_4 = arith.constant 0 : index
    %c0_5 = arith.constant 0 : index
    %4 = vector.load %arg2[%c0_3, %c0_4, %c0_5] : memref<1x4x512xf32, #tpu.memory_space<vmem>>, vector<1x4x512xf32>
    %cst = arith.constant dense<0.000000e+00> : vector<1x4xf32>
    %5 = vector.multi_reduction <add>, %4, %cst [2] : vector<1x4x512xf32> to vector<1x4xf32>
    %6 = vector.shape_cast %5 : vector<1x4xf32> to vector<1x4x1xf32>
    %7 = arith.addf %3, %6 : vector<1x4x1xf32>
    %c0_6 = arith.constant 0 : index
    %c0_7 = arith.constant 0 : index
    %c0_8 = arith.constant 0 : index
    %8 = vector.load %arg3[%c0_6, %c0_7, %c0_8] : memref<1x4x1xf32, #tpu.memory_space<vmem>>, vector<1x4x1xf32>
    tpu.vector_store %arg3[%c0_6, %c0_7, %c0_8], %7 {strides = array<i32>} : memref<1x4x1xf32, #tpu.memory_space<vmem>>, vector<1x4x1xf32>,
    return
  }
  func.func @transform_0(%arg0: i32, %arg1: i32) -> (i32, i32, i32) {
    %c0_i32 = arith.constant 0 : i32
    %c0_i32_0 = arith.constant 0 : i32
    return %arg0, %c0_i32, %arg1 : i32, i32, i32
  }
  func.func @transform_1(%arg0: i32, %arg1: i32) -> (i32, i32, i32) {
    %c0_i32 = arith.constant 0 : i32
    %c0_i32_0 = arith.constant 0 : i32
    %c0_i32_1 = arith.constant 0 : i32
    return %arg0, %c0_i32, %c0_i32_0 : i32, i32, i32
  }
}

</mosaic_0001>

<bundles_post_ra>
// kernel: tpu_custom_call.1
= control target key start
LH: loop header
LB: loop body
LE: loop exit
PB: predicated region body
PF: predicated region fallthrough
CT: control target
= control target key end

     0   :  { %6 = vsyncpa [#allocation3], 0  ;;  %s515_s0 = inlined_call_operand.hbm [shape: f32[2,4,512], index: 0, kind: input, shape index: {}]   ;;  %s516_s1 = inlined_call_operand.vmem [shape: f32[2,4,1], index: 1, kind: output, shape index: {}]  }
   0x1   :  { %8 = vsyncpa [#allocation3 + $0x1], 0  ;;  %s425_s6 = smov 0   ;;  %s427_s7 = smov 0  }
   0x2   :  { %s429_s8 = smov 0   ;;  %s431_s9 = smov 0  }
   0x3   :  { %s433_s10 = smov 0   ;;  %s435_s11 = smov 0  }
   0x4 LB: > { %s263_s12 = sadd.s32 4294967295, %s412_s11   ;;  %s26_s13 = sadd.s32 1, %s408_s10  ;;  %s412_s11 = sphi %s435_s11, %s14_s11   ;;  %s408_s10 = sphi %s433_s10, %s523_s10   ;;  %s404_s9 = sphi %s431_s9, %s522_s9   ;;  %s400_s8 = sphi %s429_s8, %s521_s8   ;;  %s396_s7 = sphi %s427_s7, %s520_s7   ;;  %s392_s6 = sphi %s425_s6, %s519_s6  }
   0x5   : > { %p28_p0 = scmp.ge.s32.totalorder %s26_s13, 2  ;;  %s35_s14 = sadd.s32 1, %s400_s8 }
   0x6   : > { %p42_p1 = scmp.ne.s32.totalorder %s400_s8, %s396_s7  ;;  %p43_p2 = scmp.eq.s32.totalorder %s412_s11, 0 }
   0x7   : > { %s525_s13 = smov (%p28_p0, %s26_s13), 0  ;;  %p48_p4 = scmp.ne.s32.totalorder %s396_s7, %s392_s6 }
   0x8   : > { %p461_p3 = por %p43_p2, %p42_p1  ;;  %s30_s16 = ssub.s32 %s408_s10, %s525_s13 }
   0x9   : > { %p49_p5 = scmp.eq.s32.totalorder %s263_s12, 0  ;;  %p33_p6 = scmp.eq.s32.totalorder %s30_s16, 0 }
   0xa   : > { %p282_p8 = scmp.lt.s32.totalorder %s412_s11, 2  ;;  %s98_s19 = sand.u32 1, %s400_s8  }
   0xb   : > { %p468_p7 = por %p49_p5, %p48_p4  ;;  %s275_s20 = sshll.u32 %s408_s10, 4 }
   0xc   : > { %s474_s18 = scalar_select %p33_p6, %s400_s8, %s35_s14  }
   0xd   : > { %s267_s21 = sshll.u32 %s98_s19, 4  ;;  %s109_s24 = scalar_lea.hbm %s515_s0, %s275_s20 }
   0xe   : > { %s111_s25 = sshll.u32 %s109_s24, 4  ;;  %s102_s26 = scalar_lea.vmem [#allocation2], %s267_s21  ;;  %s112_s25 = int_to_ptr.hbm [resolvable:$true] %s111_s25 }
   0xf   : > { %s113_s27 = sshll.u32 %s102_s26, 4  ;;  %p279_p9 = pnand %p282_p8, %p461_p3  ;;  %s114_s27 = int_to_ptr.vmem [resolvable:$true] %s113_s27 }
  0x10   : > { %p270_p10 = scmp.ge.s32.totalorder %s412_s11, 1  ;;  %p118_p11 = scmp.lt.s32.totalorder %s412_s11, 3 }
  0x11   : > { %s99_s28 = scalar_lea.sflag [#allocation3], %s98_s19 }
  0x12   : > { %281 = dma.hbm_to_vmem [thread:$0]  (!%p279_p9), %s112_s25, 256, %s114_s27, %s99_s28  }
  0x13   : > { %p119_p12 = pnand %p270_p10, %p118_p11 }
  0x14   : > { %s124_s29 = sand.u32 (!%p119_p12), 1, %s396_s7  }
  0x15   : > { %122 = sbr.rel (%p119_p12) target bundleno = 163 (0xa3), region = 24  ;;  %s271_s30 = sshll.u32 (!%p119_p12), %s124_s29, 4 }
  0x16   : > { %s125_s2 = scalar_lea.sflag (!%p119_p12), [#allocation3], %s124_s29  ;;  %s128_s3 = scalar_lea.vmem (!%p119_p12), [#allocation2], %s271_s30 }
  0x1a   : > { %387 = dma.done.wait (%p468_p7), %s125_s2, 256  }
  0x1b   : > { %389 = vsyncadd (%p468_p7), %s125_s2, 4294967040  ;;  %p148_p13 = scmp.lt.s32.totalorder %s404_s9, 1  ;;  %vm156_vm0 = vcmask 3072   ;;  %v414_v0 = vmov 0.0   ;;  %v159_v1 = vld [vmem:[%s128_s3] sm:$0xff]  ;;  %v160_v2 = vld [vmem:[%s128_s3 + $0x8] sm:$0xff] }
  0x1c   : > { %163 = vst [vmem:[#allocation1] ss:$2 sm:$0xff] %v159_v1  ;;  %vm174_vm1 = vcmask 1043456  }
  0x1d   : > { %s527_s9 = smov (!%p148_p13, %s404_s9), 1  ;;  %165 = vst [vmem:[#allocation1 + $0x10] ss:$2 sm:$0xff] %v160_v2 }
  0x1e   : > { %s272_s4 = sshll.u32 %s527_s9, 2 }
  0x1f   : > { %s151_s12 = scalar_lea.vmem %s516_s1, %s272_s4 }
  0x20   : > { %157 = vst.msk [vmem:[%s151_s12] sm:$0xf] %vm156_vm0, %v414_v0 }
  0x23   : > { %v166_v3 = vld.sshfl [vmem:[#allocation1] sm:$0xff pattern:$0x75316420]  ;;  %v167_v4 = vld.sshfl [vmem:[#allocation1 + $0x8] sm:$0xff pattern:$0x75316420] }
  0x24   : > { %v168_v5 = vld.sshfl [vmem:[#allocation1 + $0x10] sm:$0xff pattern:$0x75316420]  ;;  %v169_v6 = vld.sshfl [vmem:[#allocation1 + $0x18] sm:$0xff pattern:$0x75316420] }
  0x25   : > { %v175_v7 = vsel %vm174_vm1, %v166_v3, 0.0  ;;  %v176_v8 = vsel %vm174_vm1, %v167_v4, 0.0  ;;  %v178_v9 = vsel %vm174_vm1, %v168_v5, 0.0  ;;  %v180_v11 = vsel %vm174_vm1, %v169_v6, 0.0 }
  0x26   : > { %v177_v10 = vadd.f32 %v176_v8, %v175_v7 }
  0x27   : > { %v158_v14 = vld [vmem:[%s151_s12] sm:$0xf] }
  0x28   : > { %v179_v12 = vadd.f32 %v178_v9, %v177_v10 }
  0x2a   : > { %v181_v13 = vadd.f32 %v180_v11, %v179_v12 }
  0x2c   : > { %182 = vadd.xlane.f32.xlu0 %v181_v13 }
  0x9f   : > { %v183_v15 = vpop.xlane.xlu0 %182 }
  0xa0   : > { %v184_v16 = vadd.f32 %v183_v15, %v158_v14 }
  0xa2   : > { %186 = vst.msk [vmem:[%s151_s12] sm:$0xf] %vm156_vm0, %v184_v16 }
  0xa3 PF: > { %s14_s11 = sadd.s32 1, %s412_s11   ;;  %s519_s6 = smov %s396_s7 }
  0xa4   : > { %p11_p0 = scmp.ge.s32.totalorder %s14_s11, 4   ;;  %s520_s7 = smov %s400_s8 }
  0xa5   : > { %s521_s8 = smov %s474_s18  ;;  %s522_s9 = smov %s408_s10 }
  0xa6   : > { %s523_s10 = smov %s525_s13  ;;  %13 = sbr.rel (!%p11_p0) target bundleno = 4 (0x4), region = 69 }
  0xab   :  { %206 = vsyncpa [#allocation3], 1 }
  0xac   :  { %208 = vsyncpa [#allocation3 + $0x1], 1 }

</bundles_post_ra>
